<compile_context>
chip_gen: v6e
topology: v6e:2x2x1
jax: 0.10.0
libtpu: 0.0.40
codegen_flags: <defaults>
</compile_context>

<pallas_src>
import functools

import jax
import jax.numpy as jnp
import numpy as np
from jax import lax
from jax.experimental import pallas as pl
from jax.experimental.pallas import tpu as pltpu

_LANES = 128


def _loss_kernel(x_ref, t_ref, halo_ref, o_ref, *,
                 alpha, gamma, temporal_weight, context_window,
                 bce_weight, focal_weight, block_rows, rem):
    step = pl.program_id(0)

    x = x_ref[...].astype(jnp.float32)      # (block_rows, 128) logits
    t = t_ref[...].astype(jnp.float32)      # (block_rows, 128) targets (0/1)

    # --- BCEWithLogits + focal term, one shared exponential -----------------
    # Binary targets: z = x if t==1 else -x; bce = softplus(-z); pt = sigmoid(z)
    z = (t + t - 1.0) * x
    e = jnp.exp(-jnp.abs(z))                               # EUP #1
    bce = jnp.maximum(-z, 0.0) + jnp.log1p(e)              # EUP #2
    # 1 - pt == sigmoid(-z); log(pt) == -bce exactly, so the reference's
    # explicit +1e-8 epsilon is dropped (diverges only for |logit| > ~14).
    one_minus_pt = jnp.where(z >= 0.0, e, 1.0) * pl.reciprocal(1.0 + e,
                                                               approx=True)
    if float(gamma) == 2.0:
        mod = one_minus_pt * one_minus_pt
    elif float(gamma) == 3.0:
        mod = one_minus_pt * one_minus_pt * one_minus_pt
    else:
        # TODO(synk): fractional gammas from the epoch schedule still lower to
        # jnp.power (log+exp on the EUP); quantize the schedule if this path
        # becomes hot.
        mod = jnp.power(one_minus_pt, gamma)
    focal = alpha * mod * bce                               # == -a*mod*log(pt)
    combined = bce_weight * bce + focal_weight * focal

    # --- temporal re-weighting: window-OR via banded matmuls on the MXU -----
    # combined[i] *= temporal_weight  iff  t[i]==1 and any(t[i-cw:i]==1).
    # Flat order is row-major over (rows, 128):
    #   same-row part : prev_cnt[r,L] += sum_j t[r,j]   * [1 <= L-j <= cw]
    #   wrapped part  : prev_cnt[r,L] += sum_j t[r-1,j] * [j-L >= 128-cw]
    cw = context_window
    src = lax.broadcasted_iota(jnp.int32, (_LANES, _LANES), 0)   # source lane j
    dst = lax.broadcasted_iota(jnp.int32, (_LANES, _LANES), 1)   # dest lane L
    d = dst - src
    band_same = jnp.logical_and(d >= 1, d <= cw).astype(jnp.bfloat16)
    band_wrap = (d <= cw - _LANES).astype(jnp.bfloat16)

    t_b = t.astype(jnp.bfloat16)            # exact for 0/1 targets
    same_cnt = jnp.dot(t_b, band_same, preferred_element_type=jnp.float32)
    wrap_src = jnp.dot(t_b, band_wrap, preferred_element_type=jnp.float32)

    # previous block's last target row (zero context for the first block)
    halo_last = halo_ref[7:8, :].astype(jnp.float32) * (step > 0).astype(
        jnp.float32)
    halo_wrap = jnp.dot(halo_last.astype(jnp.bfloat16), band_wrap,
                        preferred_element_type=jnp.float32)      # (1, 128)

    row = lax.broadcasted_iota(jnp.int32, (block_rows, _LANES), 0)
    wrap_cnt = jnp.where(row == 0, halo_wrap,
                         pltpu.roll(wrap_src, shift=1, axis=0))
    reweight = jnp.logical_and(t > 0.5, same_cnt + wrap_cnt > 0.5)
    combined = jnp.where(reweight, combined * temporal_weight, combined)

    # --- per-block (8,128) partial-sum tile: VPU adds only ------------------
    def store(vals):
        tile = vals.reshape(block_rows // 8, 8, _LANES).sum(axis=0)
        o_ref[...] = tile.reshape(1, 8, _LANES)

    if rem == block_rows * _LANES:          # no tail padding anywhere (static)
        store(combined)
    else:
        lane = lax.broadcasted_iota(jnp.int32, (block_rows, _LANES), 1)
        is_last = step == pl.num_programs(0) - 1

        @pl.when(is_last)
        def _():
            store(jnp.where(row * _LANES + lane < rem, combined, 0.0))

        @pl.when(jnp.logical_not(is_last))
        def _():
            store(combined)


def combined_temporal_focal_bce_loss(outputs, targets, epoch=None, *,
                                     alpha=0.25, gamma=2.0,
                                     temporal_weight=0.8, context_window=5,
                                     bce_weight=0.5, focal_weight=0.5,
                                     block_rows=2048):
    """JAX/Pallas equivalent of CombinedTemporalFocalBCELoss.forward.

    Binary (0/1) targets assumed (same assumption the reference makes in its
    `targets == 1` tests).  Targets may be passed as bool/int8 and logits as
    bf16 to cut HBM traffic; the kernel casts to f32 internally.
    """
    if epoch:  # matches PyTorch truthiness: epoch=None/0 -> no schedule update
        alpha = min(0.5, 0.25 + epoch * 0.01)
        gamma = min(3.0, 2.0 + epoch * 0.05)

    assert context_window < _LANES  # TODO(synk): support windows >= 128 lanes

    outputs = outputs.reshape(-1)
    targets = targets.reshape(-1)
    n = int(outputs.shape[0])

    # Tile-safe row multiples for narrow dtypes (f32 -> 8, bf16 -> 16, i8 -> 32)
    itemsize = min(outputs.dtype.itemsize, targets.dtype.itemsize)
    row_mult = max(8, 32 // int(itemsize))
    block_rows = max(row_mult, -(-int(block_rows) // row_mult) * row_mult)

    rows = -(-n // _LANES)                    # ceil(n / 128)
    rows = -(-rows // row_mult) * row_mult
    if rows > block_rows:
        rows = -(-rows // block_rows) * block_rows
    else:
        block_rows = rows
    grid = rows // block_rows
    n_pad = rows * _LANES
    pad = n_pad - n
    if pad:
        outputs = jnp.pad(outputs, (0, pad))
        targets = jnp.pad(targets, (0, pad))
    x2 = outputs.reshape(rows, _LANES)
    t2 = targets.reshape(rows, _LANES)

    rem = n - (grid - 1) * block_rows * _LANES   # valid elems in last block
    hblk = block_rows // 8                       # halo index units (8 rows)

    kernel = functools.partial(
        _loss_kernel,
        alpha=float(alpha), gamma=float(gamma),
        temporal_weight=float(temporal_weight),
        context_window=int(context_window),
        bce_weight=float(bce_weight), focal_weight=float(focal_weight),
        block_rows=int(block_rows), rem=int(rem),
    )

    psums = pl.pallas_call(
        kernel,
        out_shape=jax.ShapeDtypeStruct((grid, 8, _LANES), jnp.float32),
        grid_spec=pltpu.PrefetchScalarGridSpec(
            num_scalar_prefetch=0,
            grid=(grid,),
            in_specs=[
                pl.BlockSpec((block_rows, _LANES), lambda i: (i, 0)),
                pl.BlockSpec((block_rows, _LANES), lambda i: (i, 0)),
                # 8-row halo: previous block's last target row lives in row 7.
                pl.BlockSpec((8, _LANES),
                             lambda i: (jnp.maximum(i * hblk - 1, 0), 0)),
            ],
            out_specs=pl.BlockSpec((1, 8, _LANES), lambda i: (i, 0, 0)),
        ),
        compiler_params=pltpu.CompilerParams(
            dimension_semantics=("parallel",),
            vmem_limit_bytes=48 * 1024 * 1024),
    )(x2, t2, t2)

    return jnp.sum(psums) / n


def _reference_numpy(outputs, targets, alpha=0.25, gamma=2.0,
                     temporal_weight=0.8, context_window=5,
                     bce_weight=0.5, focal_weight=0.5):
    x = np.asarray(outputs, np.float32)
    t = np.asarray(targets, np.float32)
    bce = np.maximum(x, 0.0) - x * t + np.log1p(np.exp(-np.abs(x)))
    p = 1.0 / (1.0 + np.exp(-x))
    pt = np.where(t == 1.0, p, 1.0 - p)
    focal = -alpha * (1.0 - pt) ** gamma * np.log(pt + 1e-8)
    c = bce_weight * bce + focal_weight * focal
    for i in range(1, len(t)):
        if t[i] == 1 and np.any(t[max(0, i - context_window):i] == 1):
            c[i] *= temporal_weight
    return c.mean()


if __name__ == "__main__":
    key = jax.random.PRNGKey(0)
    k1, k2 = jax.random.split(key)

    N = 3000  # not a multiple of 128 -> exercises tail masking
    outputs = jax.random.normal(k1, (N,), jnp.float32) * 2.0
    targets = (jax.random.uniform(k2, (N,)) < 0.3).astype(jnp.float32)

    # Small block_rows so the multi-step grid + cross-block halo (temporal
    # window across tile boundaries) is exercised.
    loss = combined_temporal_focal_bce_loss(outputs, targets, epoch=None,
                                            block_rows=8)
    loss = jax.block_until_ready(loss)
    ref = _reference_numpy(np.array(outputs), np.array(targets))
    np.testing.assert_allclose(np.array(loss), ref, rtol=1e-3, atol=1e-4)

    # Single-block (default tiling) path with tail padding.
    loss2 = combined_temporal_focal_bce_loss(outputs[:300], targets[:300])
    loss2 = jax.block_until_ready(loss2)
    ref2 = _reference_numpy(np.array(outputs[:300]), np.array(targets[:300]))
    np.testing.assert_allclose(np.array(loss2), ref2, rtol=1e-3, atol=1e-4)

    print("KERNEL_OK")
</pallas_src>

<mosaic_0001>
module attributes {stable_mosaic.version = 11 : i64} {
  func.func @_loss_kernel(%arg0: i32, %arg1: memref<8x128xf32, #tpu.memory_space<vmem>>, %arg2: memref<8x128xf32, #tpu.memory_space<vmem>>, %arg3: memref<8x128xf32, #tpu.memory_space<vmem>>, %arg4: memref<1x8x128xf32, #tpu.memory_space<vmem>>) attributes {dimension_semantics = [#tpu.dimension_semantics<parallel>], iteration_bounds = array<i64: 3>, scalar_prefetch = 0 : i64, scratch_operands = 0 : i64, tpu.core_type = #tpu.core_type<tc>, window_params = [{transform_indices = @transform_0, window_bounds = array<i64: 8, 128>}, {transform_indices = @transform_1, window_bounds = array<i64: 8, 128>}, {transform_indices = @transform_2, window_bounds = array<i64: 8, 128>}, {transform_indices = @transform_3, window_bounds = array<i64: 1, 8, 128>}]} {
    %c0 = arith.constant 0 : index
    %c0_0 = arith.constant 0 : index
    %0 = vector.load %arg1[%c0, %c0_0] : memref<8x128xf32, #tpu.memory_space<vmem>>, vector<8x128xf32>
    %c0_1 = arith.constant 0 : index
    %c0_2 = arith.constant 0 : index
    %1 = vector.load %arg2[%c0_1, %c0_2] : memref<8x128xf32, #tpu.memory_space<vmem>>, vector<8x128xf32>
    %2 = arith.addf %1, %1 : vector<8x128xf32>
    %cst = arith.constant 1.000000e+00 : f32
    %3 = vector.broadcast %cst : f32 to vector<8x128xf32>
    %4 = arith.subf %2, %3 : vector<8x128xf32>
    %5 = arith.mulf %4, %0 : vector<8x128xf32>
    %6 = math.absf %5 : vector<8x128xf32>
    %cst_3 = arith.constant 0.000000e+00 : f32
    %7 = vector.broadcast %cst_3 : f32 to vector<8x128xf32>
    %8 = arith.subf %7, %6 : vector<8x128xf32>
    %9 = math.exp %8 : vector<8x128xf32>
    %cst_4 = arith.constant 0.000000e+00 : f32
    %10 = vector.broadcast %cst_4 : f32 to vector<8x128xf32>
    %11 = arith.subf %10, %5 : vector<8x128xf32>
    %cst_5 = arith.constant 0.000000e+00 : f32
    %12 = vector.broadcast %cst_5 : f32 to vector<8x128xf32>
    %13 = arith.maximumf %11, %12 : vector<8x128xf32>
    %14 = math.log1p %9 : vector<8x128xf32>
    %15 = arith.addf %13, %14 : vector<8x128xf32>
    %cst_6 = arith.constant 0.000000e+00 : f32
    %16 = vector.broadcast %cst_6 : f32 to vector<8x128xf32>
    %17 = arith.cmpf oge, %5, %16 : vector<8x128xf32>
    %cst_7 = arith.constant 1.000000e+00 : f32
    %18 = vector.broadcast %cst_7 : f32 to vector<8x128xf32>
    %19 = arith.select %17, %9, %18 : vector<8x128xi1>, vector<8x128xf32>
    %cst_8 = arith.constant 1.000000e+00 : f32
    %20 = vector.broadcast %cst_8 : f32 to vector<8x128xf32>
    %21 = arith.addf %20, %9 : vector<8x128xf32>
    %22 = tpu.reciprocal %21 {approx = true} : vector<8x128xf32> -> vector<8x128xf32>
    %23 = arith.mulf %19, %22 : vector<8x128xf32>
    %24 = arith.mulf %23, %23 : vector<8x128xf32>
    %cst_9 = arith.constant 2.500000e-01 : f32
    %25 = vector.broadcast %cst_9 : f32 to vector<8x128xf32>
    %26 = arith.mulf %25, %24 : vector<8x128xf32>
    %27 = arith.mulf %26, %15 : vector<8x128xf32>
    %cst_10 = arith.constant 5.000000e-01 : f32
    %28 = vector.broadcast %cst_10 : f32 to vector<8x128xf32>
    %29 = arith.mulf %28, %15 : vector<8x128xf32>
    %cst_11 = arith.constant 5.000000e-01 : f32
    %30 = vector.broadcast %cst_11 : f32 to vector<8x128xf32>
    %31 = arith.mulf %30, %27 : vector<8x128xf32>
    %32 = arith.addf %29, %31 : vector<8x128xf32>
    %33 = tpu.iota {dimensions = array<i32: 0>} : vector<128x128xi32>
    %34 = tpu.iota {dimensions = array<i32: 1>} : vector<128x128xi32>
    %35 = arith.subi %34, %33 : vector<128x128xi32>
    %c1_i32 = arith.constant 1 : i32
    %36 = vector.broadcast %c1_i32 : i32 to vector<128x128xi32>
    %37 = arith.cmpi sge, %35, %36 : vector<128x128xi32>
    %c5_i32 = arith.constant 5 : i32
    %38 = vector.broadcast %c5_i32 : i32 to vector<128x128xi32>
    %39 = arith.cmpi sle, %35, %38 : vector<128x128xi32>
    %40 = arith.andi %37, %39 : vector<128x128xi1>
    %41 = arith.extui %40 : vector<128x128xi1> to vector<128x128xi32>
    %42 = arith.sitofp %41 : vector<128x128xi32> to vector<128x128xf32>
    %43 = arith.truncf %42 : vector<128x128xf32> to vector<128x128xbf16>
    %c-123_i32 = arith.constant -123 : i32
    %44 = vector.broadcast %c-123_i32 : i32 to vector<128x128xi32>
    %45 = arith.cmpi sle, %35, %44 : vector<128x128xi32>
    %46 = arith.extui %45 : vector<128x128xi1> to vector<128x128xi32>
    %47 = arith.sitofp %46 : vector<128x128xi32> to vector<128x128xf32>
    %48 = arith.truncf %47 : vector<128x128xf32> to vector<128x128xbf16>
    %49 = arith.truncf %1 : vector<8x128xf32> to vector<8x128xbf16>
    %cst_12 = arith.constant dense<0.000000e+00> : vector<8x128xf32>
    %50 = tpu.matmul %49, %43, %cst_12 {dimension_numbers = #tpu.dot_dimension_numbers<[1], [0], [0], [1], [0, 0, 1, 1], [], []>} : vector<8x128xbf16>, vector<128x128xbf16>, vector<8x128xf32> -> vector<8x128xf32>
    %cst_13 = arith.constant dense<0.000000e+00> : vector<8x128xf32>
    %51 = tpu.matmul %49, %48, %cst_13 {dimension_numbers = #tpu.dot_dimension_numbers<[1], [0], [0], [1], [0, 0, 1, 1], [], []>} : vector<8x128xbf16>, vector<128x128xbf16>, vector<8x128xf32> -> vector<8x128xf32>
    %c7 = arith.constant 7 : index
    %c0_14 = arith.constant 0 : index
    %52 = vector.load %arg3[%c7, %c0_14] : memref<8x128xf32, #tpu.memory_space<vmem>>, vector<1x128xf32>
    %c0_i32 = arith.constant 0 : i32
    %53 = arith.cmpi sgt, %arg0, %c0_i32 : i32
    %54 = arith.extui %53 : i1 to i32
    %55 = arith.sitofp %54 : i32 to f32
    %56 = vector.broadcast %55 : f32 to vector<1x128xf32>
    %57 = arith.mulf %52, %56 : vector<1x128xf32>
    %58 = arith.truncf %57 : vector<1x128xf32> to vector<1x128xbf16>
    %cst_15 = arith.constant dense<0.000000e+00> : vector<1x128xf32>
    %59 = tpu.matmul %58, %48, %cst_15 {dimension_numbers = #tpu.dot_dimension_numbers<[1], [0], [0], [1], [0, 0, 1, 1], [], []>} : vector<1x128xbf16>, vector<128x128xbf16>, vector<1x128xf32> -> vector<1x128xf32>
    %60 = tpu.iota {dimensions = array<i32: 0>} : vector<8x128xi32>
    %c0_i32_16 = arith.constant 0 : i32
    %61 = vector.broadcast %c0_i32_16 : i32 to vector<8x128xi32>
    %62 = arith.cmpi eq, %60, %61 : vector<8x128xi32>
    %c1_i32_17 = arith.constant 1 : i32
    %63 = tpu.dynamic_rotate %51 by %c1_i32_17 dim 0 : vector<8x128xf32>, i32 -> vector<8x128xf32>
    %64 = vector.shape_cast %59 : vector<1x128xf32> to vector<1x128xf32>
    %65 = vector.broadcast %64 : vector<1x128xf32> to vector<8x128xf32>
    %66 = arith.select %62, %65, %63 : vector<8x128xi1>, vector<8x128xf32>
    %cst_18 = arith.constant 5.000000e-01 : f32
    %67 = vector.broadcast %cst_18 : f32 to vector<8x128xf32>
    %68 = arith.cmpf ogt, %1, %67 : vector<8x128xf32>
    %69 = arith.addf %50, %66 : vector<8x128xf32>
    %cst_19 = arith.constant 5.000000e-01 : f32
    %70 = vector.broadcast %cst_19 : f32 to vector<8x128xf32>
    %71 = arith.cmpf ogt, %69, %70 : vector<8x128xf32>
    %72 = arith.andi %68, %71 : vector<8x128xi1>
    %cst_20 = arith.constant 8.000000e-01 : f32
    %73 = vector.broadcast %cst_20 : f32 to vector<8x128xf32>
    %74 = arith.mulf %32, %73 : vector<8x128xf32>
    %75 = arith.select %72, %74, %32 : vector<8x128xi1>, vector<8x128xf32>
    %76 = tpu.iota {dimensions = array<i32: 1>} : vector<8x128xi32>
    %c2_i32 = arith.constant 2 : i32
    %77 = arith.cmpi eq, %arg0, %c2_i32 : i32
    %78 = arith.extui %77 : i1 to i32
    %c0_i32_21 = arith.constant 0 : i32
    %79 = arith.cmpi ne, %78, %c0_i32_21 : i32
    scf.if %79 {
      %c128_i32 = arith.constant 128 : i32
      %83 = vector.broadcast %c128_i32 : i32 to vector<8x128xi32>
      %84 = arith.muli %60, %83 : vector<8x128xi32>
      %85 = arith.addi %84, %76 : vector<8x128xi32>
      %c952_i32 = arith.constant 952 : i32
      %86 = vector.broadcast %c952_i32 : i32 to vector<8x128xi32>
      %87 = arith.cmpi slt, %85, %86 : vector<8x128xi32>
      %cst_23 = arith.constant 0.000000e+00 : f32
      %88 = vector.broadcast %cst_23 : f32 to vector<8x128xf32>
      %89 = arith.select %87, %75, %88 : vector<8x128xi1>, vector<8x128xf32>
      %90 = vector.shape_cast %89 : vector<8x128xf32> to vector<1x8x128xf32>
      %cst_24 = arith.constant dense<0.000000e+00> : vector<8x128xf32>
      %91 = vector.multi_reduction <add>, %90, %cst_24 [0] : vector<1x8x128xf32> to vector<8x128xf32>
      %92 = vector.shape_cast %91 : vector<8x128xf32> to vector<1x8x128xf32>
      %c0_25 = arith.constant 0 : index
      %c0_26 = arith.constant 0 : index
      %c0_27 = arith.constant 0 : index
      %93 = vector.load %arg4[%c0_25, %c0_26, %c0_27] : memref<1x8x128xf32, #tpu.memory_space<vmem>>, vector<1x8x128xf32>
      tpu.vector_store %arg4[%c0_25, %c0_26, %c0_27], %92 {strides = array<i32>} : memref<1x8x128xf32, #tpu.memory_space<vmem>>, vector<1x8x128xf32>,
    } else {
    }
    %true = arith.constant true
    %80 = arith.xori %77, %true : i1
    %81 = arith.extui %80 : i1 to i32
    %c0_i32_22 = arith.constant 0 : i32
    %82 = arith.cmpi ne, %81, %c0_i32_22 : i32
    scf.if %82 {
      %83 = vector.shape_cast %75 : vector<8x128xf32> to vector<1x8x128xf32>
      %cst_23 = arith.constant dense<0.000000e+00> : vector<8x128xf32>
      %84 = vector.multi_reduction <add>, %83, %cst_23 [0] : vector<1x8x128xf32> to vector<8x128xf32>
      %85 = vector.shape_cast %84 : vector<8x128xf32> to vector<1x8x128xf32>
      %c0_24 = arith.constant 0 : index
      %c0_25 = arith.constant 0 : index
      %c0_26 = arith.constant 0 : index
      %86 = vector.load %arg4[%c0_24, %c0_25, %c0_26] : memref<1x8x128xf32, #tpu.memory_space<vmem>>, vector<1x8x128xf32>
      tpu.vector_store %arg4[%c0_24, %c0_25, %c0_26], %85 {strides = array<i32>} : memref<1x8x128xf32, #tpu.memory_space<vmem>>, vector<1x8x128xf32>,
    } else {
    }
    return
  }
  func.func @transform_0(%arg0: i32) -> (i32, i32) {
    %c0_i32 = arith.constant 0 : i32
    %c0_i32_0 = arith.constant 0 : i32
    return %arg0, %c0_i32 : i32, i32
  }
  func.func @transform_1(%arg0: i32) -> (i32, i32) {
    %c0_i32 = arith.constant 0 : i32
    %c0_i32_0 = arith.constant 0 : i32
    return %arg0, %c0_i32 : i32, i32
  }
  func.func @transform_2(%arg0: i32) -> (i32, i32) {
    %c1_i32 = arith.constant 1 : i32
    %0 = arith.muli %arg0, %c1_i32 : i32
    %c1_i32_0 = arith.constant 1 : i32
    %1 = arith.subi %0, %c1_i32_0 : i32
    %c0_i32 = arith.constant 0 : i32
    %2 = arith.maxsi %1, %c0_i32 : i32
    %c0_i32_1 = arith.constant 0 : i32
    %c0_i32_2 = arith.constant 0 : i32
    return %2, %c0_i32_1 : i32, i32
  }
  func.func @transform_3(%arg0: i32) -> (i32, i32, i32) {
    %c0_i32 = arith.constant 0 : i32
    %c0_i32_0 = arith.constant 0 : i32
    %c0_i32_1 = arith.constant 0 : i32
    return %arg0, %c0_i32, %c0_i32_0 : i32, i32, i32
  }
}

</mosaic_0001>

<bundles_post_ra>
// kernel: tpu_custom_call.1
= control target key start
LH: loop header
LB: loop body
LE: loop exit
PB: predicated region body
PF: predicated region fallthrough
CT: control target
= control target key end

     0   :  { %s1690_s0 = inlined_call_operand.hbm [shape: f32[24,128], index: 0, kind: input, shape index: {}]   ;;  %s1691_s1 = inlined_call_operand.hbm [shape: f32[24,128], index: 1, kind: input, shape index: {}]   ;;  %s1692_s2 = inlined_call_operand.hbm [shape: f32[24,128], index: 2, kind: input, shape index: {}]   ;;  %s1693_s3 = inlined_call_operand.hbm [shape: f32[3,8,128], index: 3, kind: output, shape index: {}]  }
   0x1   :  { %1703 = sst [smem:[#allocation13_spill]] %s1690_s0 }
   0x2   :  { %1704 = sst [smem:[#allocation14_spill]] %s1691_s1 }
   0x3   :  { %8 = vsyncpa [#allocation3], 0 }
   0x4   :  { %10 = vsyncpa [#allocation3 + $0x1], 0 }
   0x5   :  { %11 = vsyncpa [#allocation6], 0 }
   0x6   :  { %13 = vsyncpa [#allocation6 + $0x1], 0 }
   0x7   :  { %14 = vsyncpa [#allocation4], 0 }
   0x8   :  { %16 = vsyncpa [#allocation4 + $0x1], 0  ;;  %s1218_s12 = smov 0   ;;  %s1220_s13 = smov 0  }
   0x9   :  { %s1222_s14 = smov 0   ;;  %s1224_s15 = smov 0  }
   0xa   :  { %s1226_s16 = smov 0   ;;  %s1228_s17 = smov 0  }
   0xb   :  { %s1230_s18 = smov 0  }
   0xc LB: > { %s764_s19 = sadd.s32 4294967294, %s1186_s18   ;;  %s1255_s20 = sadd.s32 1, %s1186_s18   ;;  %s1186_s18 = sphi %s1230_s18, %s1758_s18   ;;  %s1182_s17 = sphi %s1228_s17, %s1757_s17   ;;  %s1178_s16 = sphi %s1226_s16, %s1756_s16   ;;  %s1174_s15 = sphi %s1224_s15, %s1755_s15   ;;  %s1170_s14 = sphi %s1222_s14, %s1754_s14   ;;  %s1166_s13 = sphi %s1220_s13, %s1753_s13   ;;  %s1162_s12 = sphi %s1218_s12, %s1752_s12  }
   0xd   : > { %s26_s21 = ssub.s32 %s1186_s18, %s1255_s20  ;;  %s29_s22 = sadd.s32 1, %s1182_s17 }
   0xe   : > { %p27_p0 = scmp.eq.s32.totalorder %s26_s21, 0  ;;  %p1695_p1 = scmp.ne.s32.totalorder %s1182_s17, %s1178_s16 }
   0xf   : > { %p1696_p2 = scmp.eq.s32.totalorder %s1186_s18, 0  ;;  %p1697_p3 = scmp.ne.s32.totalorder %s1178_s16, %s1174_s15 }
  0x10   : > { %s1266_s23 = scalar_select %p27_p0, %s1182_s17, %s29_s22  }
  0x11   : > { %p38_p4 = por %p1696_p2, %p1695_p1  ;;  %p130_p5 = scmp.eq.s32.totalorder %s764_s19, 2 }
  0x12   : > { %p1694_p6 = scmp.lt.s32.totalorder %s1186_s18, 3  ;;  %s150_s25 = sand.u32 1, %s1182_s17  }
  0x13   : > { %p1277_p7 = por %p130_p5, %p1697_p3  ;;  %s1284_s26 = sshll.u32 %s150_s25, 3 }
  0x14   : > { %s770_s27 = sshll.u32 %s1186_s18, 7  ;;  %p1289_p8 = pnand %p1694_p6, %p38_p4 }
  0x15   : > { %s1705_s24 = scalar_select %p1277_p7, 1, 0 }
  0x16   : > { %s168_s29 = sand.u32 1, %s1186_s18   ;;  %s1707_s1 = sld [smem:[#allocation14_spill]] }
  0x17   : > { %s172_s6 = scalar_lea.vmem [#allocation5], %s1284_s26  ;;  %s1304_s8 = scalar_lea.sflag [#allocation6], %s168_s29 }
  0x18   : > { %s179_s7 = sshll.u32 %s172_s6, 4  ;;  %p1008_p12 = pneg %p1289_p8  ;;  %s180_s7 = int_to_ptr.vmem [resolvable:$true] %s179_s7 }
  0x1c   : > { %s1299_s5 = scalar_lea.hbm %s1707_s1, %s770_s27  ;;  %s1011_s19 = scalar_lea.hbm %s1707_s1, 384 }
  0x1d   : > { %s1006_s9 = scalar_lea.hbm %s1299_s5, 128  ;;  %p1012_p4 = scmp.lt.s32.totalorder %s1299_s5, %s1707_s1 }
  0x1e   : > { %p1007_p11 = scmp.ne.s32.totalorder %s1299_s5, %s1006_s9  ;;  %p1013_p5 = scmp.lt.s32.totalorder %s1011_s19, %s1006_s9 }
  0x20   : > { %p1009_p13 = pnand %p1008_p12, %p1007_p11  ;;  %p1014_p6 = por %p1013_p5, %p1012_p4 }
  0x22   : > { %p1010_p0 = pneg %p1009_p13 }
  0x24   : > { %p1015_p1 = pnand %p1014_p6, %p1010_p0 }
  0x26   : > { %1018 = shalt.err (!%p1015_p1)
}
  0x27   : > { %s1019_s29 = scalar_lea.vmem %s180_s7, 128  ;;  %s1188_s30 = smov [#allocation5]  }
  0x28   : > { %p1020_p2 = scmp.ne.s32.totalorder %s180_s7, %s1019_s29  ;;  %s1024_s4 = sshll.u32 %s1188_s30, 4  ;;  %s1025_s4 = int_to_ptr.vmem [resolvable:$false] %s1024_s4 }
  0x29   : > { %s1026_s6 = scalar_lea.vmem %s1025_s4, 256  ;;  %p1027_p13 = scmp.lt.s32.totalorder %s180_s7, %s1025_s4 }
  0x2a   : > { %p1022_p3 = pnand %p1020_p2, %p1008_p12  ;;  %p1028_p9 = scmp.lt.s32.totalorder %s1026_s6, %s1019_s29 }
  0x2c   : > { %p1023_p11 = pneg %p1022_p3  ;;  %p1029_p10 = por %p1028_p9, %p1027_p13 }
  0x2e   : > { %p1030_p7 = pnand %p1029_p10, %p1023_p11 }
  0x30   : > { %1033 = shalt.err (!%p1030_p7)
}
  0x31   : > { %928 = dma.hbm_to_vmem [thread:$0]  (!%p1289_p8), %s1299_s5, 128, %s180_s7, %s1304_s8  }
  0x32   : > { %p1708_p1 = scmp.lt.s32.totalorder %s1186_s18, 4  ;;  %p1709_p2 = scmp.ge.s32.totalorder %s1186_s18, 1 }
  0x33   : > { %s1711_s0 = sld [smem:[#allocation13_spill]]  ;;  %s154_s21 = scalar_lea.vmem [#allocation2], %s1284_s26 }
  0x34   : > { %p1331_p3 = pnand %p1709_p2, %p1708_p1  ;;  %s161_s22 = sshll.u32 %s154_s21, 4  ;;  %s162_s22 = int_to_ptr.vmem [resolvable:$true] %s161_s22 }
  0x35   : > { %s151_s5 = scalar_lea.sflag [#allocation3], %s150_s25 }
  0x36   : > { %s1710_s9 = scalar_select %p1331_p3, 1, 0 }
  0x39   : > { %s1340_s19 = scalar_lea.hbm %s1711_s0, %s770_s27  ;;  %s1039_s4 = scalar_lea.hbm %s1711_s0, 384 }
  0x3a   : > { %s1034_s7 = scalar_lea.hbm %s1340_s19, 128  ;;  %p1040_p10 = scmp.lt.s32.totalorder %s1340_s19, %s1711_s0 }
  0x3b   : > { %p1035_p6 = scmp.ne.s32.totalorder %s1340_s19, %s1034_s7  ;;  %p1041_p0 = scmp.lt.s32.totalorder %s1039_s4, %s1034_s7 }
  0x3d   : > { %p1037_p7 = pnand %p1035_p6, %p1008_p12  ;;  %p1042_p4 = por %p1041_p0, %p1040_p10 }
  0x3f   : > { %p1038_p9 = pneg %p1037_p7 }
  0x41   : > { %p1043_p5 = pnand %p1042_p4, %p1038_p9 }
  0x43   : > { %1046 = shalt.err (!%p1043_p5)
}
  0x44   : > { %s1047_s26 = scalar_lea.vmem %s162_s22, 128  ;;  %s1189_s25 = smov [#allocation2]  }
  0x45   : > { %p1048_p11 = scmp.ne.s32.totalorder %s162_s22, %s1047_s26  ;;  %s1052_s10 = sshll.u32 %s1189_s25, 4  ;;  %s1053_s10 = int_to_ptr.vmem [resolvable:$false] %s1052_s10 }
  0x46   : > { %s1054_s11 = scalar_lea.vmem %s1053_s10, 256  ;;  %p1055_p2 = scmp.lt.s32.totalorder %s162_s22, %s1053_s10 }
  0x47   : > { %p1050_p13 = pnand %p1048_p11, %p1008_p12  ;;  %p1056_p6 = scmp.lt.s32.totalorder %s1054_s11, %s1047_s26 }
  0x49   : > { %p1051_p1 = pneg %p1050_p13  ;;  %p1057_p7 = por %p1056_p6, %p1055_p2 }
  0x4b   : > { %p1058_p3 = pnand %p1057_p7, %p1051_p1 }
  0x4d   : > { %1061 = shalt.err (!%p1058_p3)
}
  0x4e   : > { %925 = dma.hbm_to_vmem [thread:$0]  (!%p1289_p8), %s1340_s19, 128, %s162_s22, %s151_s5  }
  0x4f   : > { %s1364_s21 = sadd.s32 4294967295, %s1186_s18   ;;  %s766_s28 = sadd.s32 4294967295, %s1255_s20 }
  0x50   : > { %p43_p12 = scmp.eq.s32.totalorder %s1364_s21, 0  ;;  %p1699_p3 = scmp.gt.s32.totalorder %s1364_s21, 0 }
  0x51   : > { %p82_p9 = scmp.gt.s32.totalorder %s766_s28, 0  ;;  %s87_s7 = sadd.s32 1, %s1170_s14 }
  0x52   : > { %p1712_p8 = scmp.ne.s32.totalorder %s1178_s16, %s1174_s15  ;;  %p94_p0 = scmp.ne.s32.totalorder %s1170_s14, %s1166_s13 }
  0x53   : > { %s80_s22 = scalar_select %p1699_p3, %s1364_s21, 0 }
  0x54   : > { %p1375_p10 = por %p43_p12, %p1712_p8  ;;  %s1760_s28 = smov (!%p82_p9, %s766_s28), 0 }
  0x55   : > { %p1714_p4 = scmp.eq.s32.totalorder %s1186_s18, 0  ;;  %p100_p11 = scmp.ne.s32.totalorder %s1166_s13, %s1162_s12 }
  0x56   : > { %s1713_s19 = scalar_select %p1375_p10, 1, 0 }
  0x57   : > { %p1386_p5 = por %p94_p0, %p1714_p4  ;;  %s84_s29 = ssub.s32 %s80_s22, %s1760_s28 }
  0x58   : > { %p1698_p13 = scmp.eq.s32.totalorder %s1364_s21, 2  ;;  %p85_p1 = scmp.eq.s32.totalorder %s84_s29, 0 }
  0x59   : > { %p1395_p2 = por %p100_p11, %p43_p12  ;;  %p1717_p6 = scmp.ne.s32.totalorder %s1182_s17, %s1178_s16 }
  0x5a   : > { %s188_s27 = sand.u32 1, %s1170_s14   ;;  %s775_s25 = sshll.u32 %s80_s22, 7 }
  0x5b   : > { %s1716_s30 = scalar_select %p1395_p2, 1, 0 }
  0x5c   : > { %p1404_p7 = por %p1698_p13, %p1717_p6  ;;  %s773_s26 = sshll.u32 %s188_s27, 3 }
  0x5d   : > { %s1410_s6 = scalar_select %p85_p1, %s1170_s14, %s87_s7  }
  0x5e   : > { %s1718_s4 = scalar_select %p1404_p7, 1, 0 }
  0x5f   : > { %s1415_s11 = scalar_lea.hbm %s1692_s2, %s775_s25  ;;  %s190_s28 = scalar_lea.vmem [#allocation7], %s773_s26 }
  0x60   : > { %s200_s29 = sshll.u32 %s190_s28, 4  ;;  %p1719_p12 = scmp.lt.s32.totalorder %s1186_s18, 3  ;;  %s201_s29 = int_to_ptr.vmem [resolvable:$true] %s200_s29 }
  0x61   : > { %s1062_s7 = scalar_lea.hbm %s1415_s11, 128  ;;  %s1067_s25 = scalar_lea.hbm %s1692_s2, 384 }
  0x62   : > { %p1421_p9 = pnand %p1719_p12, %p1386_p5  ;;  %p1063_p8 = scmp.ne.s32.totalorder %s1415_s11, %s1062_s7 }
  0x63   : > { %p1068_p1 = scmp.lt.s32.totalorder %s1415_s11, %s1692_s2  ;;  %p1069_p5 = scmp.lt.s32.totalorder %s1067_s25, %s1062_s7 }
  0x64   : > { %p1064_p0 = pneg %p1421_p9 }
  0x65   : > { %p1070_p6 = por %p1069_p5, %p1068_p1 }
  0x66   : > { %p1065_p4 = pnand %p1064_p0, %p1063_p8 }
  0x68   : > { %p1066_p11 = pneg %p1065_p4 }
  0x6a   : > { %p1071_p12 = pnand %p1070_p6, %p1066_p11 }
  0x6c   : > { %1074 = shalt.err (!%p1071_p12)
}
  0x6d   : > { %s1075_s5 = scalar_lea.vmem %s201_s29, 128  ;;  %s1190_s10 = smov [#allocation7]  }
  0x6e   : > { %p1076_p13 = scmp.ne.s32.totalorder %s201_s29, %s1075_s5  ;;  %s1080_s28 = sshll.u32 %s1190_s10, 4  ;;  %s1081_s28 = int_to_ptr.vmem [resolvable:$false] %s1080_s28 }
  0x6f   : > { %s1082_s1 = scalar_lea.vmem %s1081_s28, 256  ;;  %p1083_p8 = scmp.lt.s32.totalorder %s201_s29, %s1081_s28 }
  0x70   : > { %p1078_p3 = pnand %p1076_p13, %p1064_p0  ;;  %p1084_p4 = scmp.lt.s32.totalorder %s1082_s1, %s1075_s5 }
  0x72   : > { %p1079_p7 = pneg %p1078_p3  ;;  %p1085_p2 = por %p1084_p4, %p1083_p8 }
  0x74   : > { %p1086_p10 = pnand %p1085_p2, %p1079_p7 }
  0x76   : > { %1089 = shalt.err (!%p1086_p10)
}
  0x77   : > { %931 = dma.hbm_to_vmem [thread:$0]  (!%p1421_p9), %s1415_s11, 128, %s201_s29, %s1304_s8  }
  0x78   : > { %p1721_p11 = scmp.ne.s32.totalorder %s1710_s9, 0 }
  0x79   : > { %s1443_s7 = sand.u32 (!%p1721_p11), 1, %s1178_s16   ;;  %p1722_p3 = scmp.ne.s32.totalorder (!%p1721_p11), %s1713_s19, 0 }
  0x7a   : > { %209 = sbr.rel (%p1721_p11) target bundleno = 444 (0x1bc), region = 32  ;;  %s1446_s22 = sshll.u32 (!%p1721_p11), %s1443_s7, 3 }
  0x7b   : > { %s212_s1 = scalar_lea.sflag (!%p1721_p11), [#allocation3], %s1443_s7  ;;  %s215_s27 = scalar_lea.vmem (!%p1721_p11), [#allocation2], %s1446_s22 }
  0x7f   : > { %1145 = dma.done.wait (%p1722_p3), %s212_s1, 128  }
  0x80   : > { %1147 = vsyncadd (%p1722_p3), %s212_s1, 4294967168  ;;  %s220_s0 = sand.u32 1, %s1364_s21   ;;  %s224_s9 = scalar_lea.vmem [#allocation5], %s1446_s22 }
  0x81   : > { %s221_s8 = scalar_lea.sflag [#allocation6], %s220_s0 }
  0x82   : > { %1149 = dma.done.wait (%p1722_p3), %s221_s8, 128  }
  0x83   : > { %1151 = vsyncadd (%p1722_p3), %s221_s8, 4294967168  ;;  %s231_s11 = sand.u32 1, %s1166_s13   ;;  %v302_v0 = vlaneseq  ;;  %p1723_p10 = scmp.ne.s32.totalorder %s1716_s30, 0 }
  0x84   : > { %s1461_s29 = sshll.u32 %s231_s11, 3 }
  0x85   : > { %s233_s25 = scalar_lea.vmem [#allocation7], %s1461_s29 }
  0x86   : > { %1153 = dma.done.wait (%p1723_p10), %s221_s8, 128  }
  0x87   : > { %1155 = vsyncadd (%p1723_p10), %s221_s8, 4294967168  ;;  %v1191_v1 = vmov 0.0   ;;  %v1470_v2 = vshrl.u32 %v302_v0, 7  ;;  %v1472_v3 = vand.u32 127, %v302_v0  ;;  %vm1192_vm0 = vmmov 0   ;;  %p1724_p13 = scmp.gt.s32.totalorder %s1364_s21, 0 }
  0x88   : > { %854 = vmatprep.subr.bf16.mxu0 %v1191_v1  ;;  %874 = vmatprep.subr.bf16.mxu1 %v1191_v1  ;;  %v1193_v6 = vmov 1.0   ;;  %vm1194_vm2 = vmmov 1   ;;  %v1195_v8 = vmov 0.0|0.0   ;;  %v522_v13 = vld [vmem:[%s233_s25 + $0x7] sm:$0x1]  ;;  %v1507_v20 = vld [vmem:[%s224_s9] sm:$0xff] }
  0x89   : > { %870 = vmatprep.mubr.msk.bf16.mxu0 %vm1192_vm0, %v1191_v1  ;;  %890 = vmatprep.mubr.msk.bf16.mxu1 %vm1192_vm0, %v1191_v1  ;;  %v318_v4 = vadd.s32 120, %v1470_v2  ;;  %v800_v7 = vpack.c.bf16 %v1193_v6, %v1191_v1  ;;  %s524_s19 = scalar_select %p1724_p13, 1, 0  ;;  %v317_v9 = vadd.s32 112, %v1470_v2  ;;  %v315_v11 = vadd.s32 96, %v1470_v2  ;;  %v270_v59 = vld [vmem:[%s215_s27] sm:$0xff] }
  0x8a   : > { %v316_v12 = vadd.s32 104, %v1470_v2  ;;  %v313_v15 = vadd.s32 80, %v1470_v2  ;;  %v314_v16 = vadd.s32 88, %v1470_v2  ;;  %v311_v25 = vadd.s32 64, %v1470_v2  ;;  %s265_s26 = scalar_lea.vmem [#allocation8], %s1446_s22  ;;  %p821_p2 = scmp.ne.s32.totalorder %s1364_s21, 2 }
  0x8b   : > { %v336_v5 = vsub.s32 %v1472_v3, %v318_v4  ;;  %s525_s30 = scvt.s32.f32 %s524_s19  ;;  %v335_v10 = vsub.s32 %v1472_v3, %v317_v9  ;;  %v333_v17 = vsub.s32 %v1472_v3, %v315_v11  ;;  %v312_v26 = vadd.s32 72, %v1470_v2 }
  0x8c   : > { %v334_v19 = vsub.s32 %v1472_v3, %v316_v12  ;;  %v331_v22 = vsub.s32 %v1472_v3, %v313_v15  ;;  %v332_v24 = vsub.s32 %v1472_v3, %v314_v16  ;;  %v1525_v27 = vpack.c.bf16 %v1507_v20, %v1507_v20 }
  0x8d   : > { %vm440_vm1 = vcmp.le.s32.totalorder %v336_v5, 4294967173  ;;  %v526_v14 = vstv %s525_s30  ;;  %vm351_vm4 = vcmp.ge.s32.totalorder %v335_v10, 1  ;;  %vm367_vm5 = vcmp.le.s32.totalorder %v335_v10, 5 }
  0x8e   : > { %vm799_vm3 = vmpackc.low %vm440_vm1, %vm1194_vm2  ;;  %vm352_vm6 = vcmp.ge.s32.totalorder %v336_v5, 1  ;;  %vm368_vm7 = vcmp.le.s32.totalorder %v336_v5, 5  ;;  %v527_v18 = vmul.f32 %v526_v14, %v522_v13  ;;  %vm349_vm10 = vcmp.ge.s32.totalorder %v333_v17, 1 }
  0x8f   : > { %855 = vmatpush3.bf16.msk.msra.mxu0 %vm799_vm3, %v800_v7  ;;  %875 = vmatpush3.bf16.msk.msra.mxu1 %vm799_vm3, %v800_v7  ;;  %vm1509_vm8 = vmand %vm351_vm4, %vm367_vm5  ;;  %vm365_vm11 = vcmp.le.s32.totalorder %v333_v17, 5  ;;  %vm350_vm12 = vcmp.ge.s32.totalorder %v334_v19, 1  ;;  %vm366_vm13 = vcmp.le.s32.totalorder %v334_v19, 5  ;;  %vm347_vm15 = vcmp.ge.s32.totalorder %v331_v22, 1 }
  0x90   : > { %856 = vmatprep.subr.bf16.mxu0 %v1191_v1  ;;  %876 = vmatprep.subr.bf16.mxu1 %v1191_v1  ;;  %vm1516_vm9 = vmand %vm352_vm6, %vm368_vm7  ;;  %v528_v28 = vpack.c.bf16 %v527_v18, %v527_v18  ;;  %vm363_vm1 = vcmp.le.s32.totalorder %v331_v22, 5  ;;  %vm348_vm3 = vcmp.ge.s32.totalorder %v332_v24, 1  ;;  %vm364_vm4 = vcmp.le.s32.totalorder %v332_v24, 5 }
  0x91   : > { %vm805_vm14 = vmpackc.low %vm1516_vm9, %vm1509_vm8  ;;  %v329_v30 = vsub.s32 %v1472_v3, %v311_v25  ;;  %v330_v32 = vsub.s32 %v1472_v3, %v312_v26  ;;  %v309_v33 = vadd.s32 48, %v1470_v2  ;;  %v310_v35 = vadd.s32 56, %v1470_v2 }
  0x92   : > { %vm1532_vm2 = vmand %vm349_vm10, %vm365_vm11  ;;  %v1196_v36 = vmov 1.0|1.0   ;;  %v307_v38 = vadd.s32 32, %v1470_v2  ;;  %v308_v39 = vadd.s32 40, %v1470_v2  ;;  %v305_v46 = vadd.s32 16, %v1470_v2 }
  0x93   : > { %857 = vmatpush3.bf16.msra.mxu0 %v1195_v8  ;;  %877 = vmatpush3.bf16.msra.mxu1 %v1195_v8  ;;  %vm1537_vm5 = vmand %vm350_vm12, %vm366_vm13  ;;  %vm345_vm11 = vcmp.ge.s32.totalorder %v329_v30, 1  ;;  %vm361_vm12 = vcmp.le.s32.totalorder %v329_v30, 5  ;;  %vm346_vm8 = vcmp.ge.s32.totalorder %v330_v32, 1  ;;  %vm362_vm9 = vcmp.le.s32.totalorder %v330_v32, 5 }
  0x94   : > { %858 = vmatprep.subr.bf16.mxu0 %v1191_v1  ;;  %878 = vmatprep.subr.bf16.mxu1 %v1191_v1  ;;  %vm1544_vm6 = vmand %vm347_vm15, %vm363_vm1  ;;  %v327_v40 = vsub.s32 %v1472_v3, %v309_v33  ;;  %v328_v41 = vsub.s32 %v1472_v3, %v310_v35  ;;  %v325_v43 = vsub.s32 %v1472_v3, %v307_v38  ;;  %v306_v47 = vadd.s32 24, %v1470_v2 }
  0x95   : > { %vm1555_vm7 = vmand %vm348_vm3, %vm364_vm4  ;;  %v326_v45 = vsub.s32 %v1472_v3, %v308_v39  ;;  %v323_v49 = vsub.s32 %v1472_v3, %v305_v46  ;;  %v304_v53 = vadd.s32 8, %v1470_v2  ;;  %v321_v55 = vsub.s32 %v1472_v3, %v1470_v2 }
  0x96   : > { %vm807_vm10 = vmpackc.low %vm1537_vm5, %vm1532_vm2  ;;  %vm343_vm15 = vcmp.ge.s32.totalorder %v327_v40, 1  ;;  %vm359_vm1 = vcmp.le.s32.totalorder %v327_v40, 5  ;;  %vm344_vm2 = vcmp.ge.s32.totalorder %v328_v41, 1  ;;  %vm360_vm3 = vcmp.le.s32.totalorder %v328_v41, 5 }
  0x97   : > { %859 = vmatpush3.bf16.msra.mxu0 %v1195_v8  ;;  %879 = vmatpush3.bf16.msra.mxu1 %v1195_v8  ;;  %vm1575_vm13 = vmand %vm345_vm11, %vm361_vm12  ;;  %vm341_vm5 = vcmp.ge.s32.totalorder %v325_v43, 1  ;;  %vm358_vm11 = vcmp.le.s32.totalorder %v326_v45, 5  ;;  %v324_v51 = vsub.s32 %v1472_v3, %v306_v47  ;;  %v322_v56 = vsub.s32 %v1472_v3, %v304_v53 }
  0x98   : > { %860 = vmatprep.subr.bf16.mxu0 %v1191_v1  ;;  %880 = vmatprep.subr.bf16.mxu1 %v1191_v1  ;;  %vm1599_vm12 = vmand %vm344_vm2, %vm360_vm3  ;;  %v272_v57 = vadd.f32 %v1507_v20, %v1507_v20  ;;  %v573_v29 = vsub.s32 0, %v1470_v2 }
  0x9a   : > { %v781_v58 = vadd.f32 -1.0, %v272_v57 }
  0x9b   : > { %861 = vmatpush3.bf16.msra.mxu0 %v1195_v8  ;;  %881 = vmatpush3.bf16.msra.mxu1 %v1195_v8 }
  0x9c   : > { %862 = vmatprep.subr.bf16.mxu0 %v1191_v1  ;;  %882 = vmatprep.subr.bf16.mxu1 %v1191_v1  ;;  %v274_v60 = vmul.f32 %v781_v58, %v270_v59 }
  0x9e   : > { %v275_v61 = vand.u32 2147483647, %v274_v60  ;;  %v279_v18 = vsub.f32 0.0, %v274_v60 }
  0x9f   : > { %863 = vmatpush3.bf16.msra.mxu0 %v1195_v8  ;;  %883 = vmatpush3.bf16.msra.mxu1 %v1195_v8 }
  0xa0   : > { %864 = vmatprep.subr.bf16.mxu0 %v1191_v1  ;;  %884 = vmatprep.subr.bf16.mxu1 %v1191_v1  ;;  %v276_v62 = vsub.f32 0.0, %v275_v61  ;;  %v280_v23 = vmax.f32 %v279_v18, 0.0 }
  0xa2   : > { %v277_v63 = vmul.f32 1.442695, %v276_v62 }
  0xa3   : > { %865 = vmatpush3.bf16.msra.mxu0 %v1195_v8  ;;  %885 = vmatpush3.bf16.msra.mxu1 %v1195_v8 }
  0xa4   : > { %866 = vmatprep.subr.bf16.mxu0 %v1191_v1  ;;  %886 = vmatprep.subr.bf16.mxu1 %v1191_v1  ;;  %1000 = vpow2.f32 %v277_v63 }
  0xa7   : > { %867 = vmatpush3.bf16.msra.mxu0 %v1195_v8  ;;  %887 = vmatpush3.bf16.msra.mxu1 %v1195_v8 }
  0xa8   : > { %868 = vmatprep.subr.bf16.mxu0 %v1191_v1  ;;  %888 = vmatprep.subr.bf16.mxu1 %v1191_v1 }
  0xab   : > { %869 = vmatpush3.bf16.msra.mxu0 %v1195_v8  ;;  %889 = vmatpush3.bf16.msra.mxu1 %v1195_v8 }
  0xac   : > { %894 = vmatprep.subr.bf16.mxu0 %v1191_v1 }
  0xae   : > { %871 = vmatmul.mubr.bf16.vlgmr.msra.gmra.mxu0 %v1525_v27  ;;  %891 = vmatmul.mubr.bf16.vlgmr.msra.gmra.mxu1 %v528_v28 }
  0xaf   : > { %895 = vmatpush3.bf16.msk.msra.mxu0 %vm805_vm14, %v1196_v36  ;;  %910 = vmatprep.mubr.msk.bf16.mxu0 %vm1192_vm0, %v1191_v1  ;;  %vm809_vm0 = vmpackc.low %vm1555_vm7, %vm1544_vm6  ;;  %vm357_vm6 = vcmp.le.s32.totalorder %v325_v43, 5 }
  0xb0   : > { %896 = vmatprep.subr.bf16.mxu0 %v1191_v1  ;;  %vm1581_vm14 = vmand %vm346_vm8, %vm362_vm9 }
  0xb1   : > { %vm811_vm4 = vmpackc.low %vm1581_vm14, %vm1575_vm13  ;;  %vm339_vm13 = vcmp.ge.s32.totalorder %v323_v49, 1  ;;  %vm355_vm14 = vcmp.le.s32.totalorder %v323_v49, 5  ;;  %v1001_v0 = vpop.eup %1000 }
  0xb2   : > { %vm1594_vm7 = vmand %vm343_vm15, %vm359_vm1  ;;  %vm340_vm15 = vcmp.ge.s32.totalorder %v324_v51, 1  ;;  %vm356_vm1 = vcmp.le.s32.totalorder %v324_v51, 5  ;;  %v281_v4 = vadd.f32 1.0, %v1001_v0  ;;  %v284_v8 = vmul.f32 -0.5, %v1001_v0 }
  0xb3   : > { %897 = vmatpush3.bf16.msk.msra.mxu0 %vm807_vm10, %v1196_v36  ;;  %vm342_vm10 = vcmp.ge.s32.totalorder %v326_v45, 1  ;;  %vm1604_vm8 = vmand %vm341_vm5, %vm357_vm6  ;;  %vm337_vm5 = vcmp.ge.s32.totalorder %v321_v55, 1  ;;  %vm353_vm6 = vcmp.le.s32.totalorder %v321_v55, 5  ;;  %v287_v17 = vand.u32 2147483647, %v1001_v0 }
  0xb4   : > { %898 = vmatprep.subr.bf16.mxu0 %v1191_v1  ;;  %vm1610_vm9 = vmand %vm342_vm10, %vm358_vm11  ;;  %vm354_vm10 = vcmp.le.s32.totalorder %v322_v56, 5  ;;  %1002 = vrcp.f32 %v281_v4  ;;  %v285_v14 = vadd.f32 1.0, %v284_v8 }
  0xb5   : > { %vm815_vm2 = vmpackc.low %vm1610_vm9, %vm1604_vm8  ;;  %1004 = vlog2.f32 %v281_v4 }
  0xb6   : > { %vm371_vm3 = vmand %vm339_vm13, %vm355_vm14  ;;  %v286_v22 = vmul.f32 %v1001_v0, %v285_v14  ;;  %vm288_vm13 = vcmp.lt.f32.partialorder %v287_v17, 0.0004427343  ;;  %vm569_vm14 = vcmp.eq.s32.totalorder %v1470_v2, 0 }
  0xb7   : > { %899 = vmatpush3.bf16.msk.msra.mxu0 %vm809_vm0, %v1196_v36  ;;  %vm813_vm0 = vmpackc.low %vm1599_vm12, %vm1594_vm7  ;;  %vm338_vm7 = vcmp.ge.s32.totalorder %v322_v56, 1 }
  0xb8   : > { %900 = vmatprep.subr.bf16.mxu0 %v1191_v1  ;;  %vm369_vm12 = vmand %vm337_vm5, %vm353_vm6 }
  0xb9   : > { %vm370_vm8 = vmand %vm338_vm7, %vm354_vm10 }
  0xba   : > { %vm819_vm9 = vmpackc.low %vm370_vm8, %vm369_vm12 }
  0xbb   : > { %901 = vmatpush3.bf16.msk.msra.mxu0 %vm811_vm4, %v1196_v36  ;;  %vm372_vm4 = vmand %vm340_vm15, %vm356_vm1  ;;  %vm576_vm15 = vcmp.gt.f32.partialorder %v1507_v20, 0.5 }
  0xbc   : > { %902 = vmatprep.subr.bf16.mxu0 %v1191_v1  ;;  %vm817_vm11 = vmpackc.low %vm372_vm4, %vm371_vm3 }
  0xbf   : > { %903 = vmatpush3.bf16.msk.msra.mxu0 %vm813_vm0, %v1196_v36  ;;  %vm291_vm0 = vcmp.ge.f32.partialorder %v274_v60, 0.0 }
  0xc0   : > { %904 = vmatprep.subr.bf16.mxu0 %v1191_v1  ;;  %v292_v15 = vsel %vm291_vm0, %v1001_v0, 1.0 }
  0xc1   : > { %v1003_v11 = vpop.eup %1002 }
  0xc2   : > { %v1005_v16 = vpop.eup %1004  ;;  %v295_v19 = vmul.f32 %v1003_v11, %v292_v15 }
  0xc3   : > { %905 = vmatpush3.bf16.msk.msra.mxu0 %vm815_vm2, %v1196_v36  ;;  %v283_v21 = vmul.f32 0.6931472, %v1005_v16 }
  0xc4   : > { %906 = vmatprep.subr.bf16.mxu0 %v1191_v1  ;;  %v296_v24 = vmul.f32 %v295_v19, %v295_v19 }
  0xc5   : > { %v289_v25 = vsel %vm288_vm13, %v286_v22, %v283_v21 }
  0xc6   : > { %v290_v26 = vadd.f32 %v289_v25, %v280_v23 }
  0xc7   : > { %907 = vmatpush3.bf16.msk.msra.mxu0 %vm817_vm11, %v1196_v36 }
  0xc8   : > { %908 = vmatprep.subr.bf16.mxu0 %v1191_v1  ;;  %v299_v30 = vmul.f32 0.5, %v290_v26 }
  0xcb   : > { %909 = vmatpush3.bf16.msk.msra.mxu0 %vm819_vm9, %v1196_v36 }
  0xce   : > { %911 = vmatmul.mubr.bf16.vlgmr.msra.gmra.mxu0 %v1525_v27  ;;  %v297_v27 = vmul.f32 0.25, %v296_v24 }
  0xd0   : > { %v298_v28 = vmul.f32 %v297_v27, %v290_v26 }
  0xd2   : > { %v300_v31 = vmul.f32 0.5, %v298_v28 }
  0xd4   : > { %v301_v34 = vadd.f32 %v300_v31, %v299_v30 }
  0xd6   : > { %v619_v38 = vmul.f32 0.8, %v301_v34 }
 0x16e   : > { %v516_v1 = vpop.f32.mrf.mxu0  ;;  %v563_v5 = vpop.f32.mrf.mxu1 }
 0x16f   : > { %v570_v32 = vrot.slane %v516_v1, 7  ;;  %v574_v33 = vrot.slane %v563_v5, %v573_v29 }
 0x170   : > { %v872_v6 = vpop.f32.mrf.mxu0  ;;  %v892_v7 = vpop.f32.mrf.mxu1 }
 0x171   : > { %v575_v35 = vsel %vm569_vm14, %v574_v33, %v570_v32 }
 0x172   : > { %v519_v9 = vpop.f32.mrf.mxu0  ;;  %v566_v10 = vpop.f32.mrf.mxu1 }
 0x174   : > { %v873_v12 = vpop.f32.mrf.mxu0  ;;  %v893_v13 = vpop.f32.mrf.mxu1 }
 0x18e   : > { %v611_v36 = vpop.f32.mrf.mxu0 }
 0x18f   : > { %v612_v37 = vadd.f32 %v611_v36, %v575_v35 }
 0x190   : > { %v912_v39 = vpop.f32.mrf.mxu0  ;;  %624 = sbr.rel (%p821_p2) target bundleno = 412 (0x19c), region = 48 }
 0x191   : > { %vm617_vm1 = vcmp.gt.f32.partialorder %v612_v37, 0.5 }
 0x192   : > { %vm618_vm2 = vmand %vm576_vm15, %vm617_vm1  ;;  %v614_v40 = vpop.f32.mrf.mxu0 }
 0x193   : > { %v620_v41 = vsel %vm618_vm2, %v619_v38, %v301_v34 }
 0x194   : > { %v913_v42 = vpop.f32.mrf.mxu0 }
 0x195   : > { %v625_v43 = vmul.u32 128, %v1470_v2 }
 0x197   : > { %v626_v44 = vadd.s32 %v625_v43, %v1472_v3 }
 0x199   : > { %vm627_vm3 = vcmp.lt.s32.totalorder %v626_v44, 952 }
 0x19a   : > { %v628_v45 = vsel %vm627_vm3, %v620_v41, 0.0 }
 0x19b   : > { %630 = vst [vmem:[%s265_s26] sm:$0xff] %v628_v45 }
 0x19c PF: > { %p1749_p7 = scmp.eq.s32.totalorder %s1364_s21, 2 }
 0x19e   : > { %634 = sbr.rel (%p1749_p7) target bundleno = 420 (0x1a4), region = 52 }
 0x1a3   : > { %636 = vst [vmem:[%s265_s26] sm:$0xff] %v620_v41 }
 0x1a4 PF: > { %s824_s12 = sshll.u32 %s1364_s21, 7  ;;  %s651_s22 = sshll.u32 %s265_s26, 4  ;;  %s652_s22 = int_to_ptr.vmem [resolvable:$true] %s651_s22 }
 0x1a5   : > { %s649_s28 = scalar_lea.hbm %s1693_s3, %s824_s12  ;;  %s638_s1 = scalar_lea.sflag [#allocation4], %s1443_s7 }
 0x1a6   : > { %s1090_s27 = scalar_lea.vmem %s652_s22, 128  ;;  %p1750_p0 = scmp.ne.s32.totalorder %s1718_s4, 0 }
 0x1a7   : > { %p1091_p9 = scmp.ne.s32.totalorder %s652_s22, %s1090_s27  ;;  %s1197_s0 = smov [#allocation8]  }
 0x1a8   : > { %s1094_s8 = sshll.u32 %s1197_s0, 4  ;;  %s1095_s8 = int_to_ptr.vmem [resolvable:$false] %s1094_s8 }
 0x1a9   : > { %p1092_p1 = pnand %p1091_p9, %p1750_p0  ;;  %s1096_s9 = scalar_lea.vmem %s1095_s8, 256 }
 0x1aa   : > { %p1097_p6 = scmp.lt.s32.totalorder %s652_s22, %s1095_s8  ;;  %p1098_p12 = scmp.lt.s32.totalorder %s1096_s9, %s1090_s27 }
 0x1ab   : > { %p1093_p5 = pneg %p1092_p1 }
 0x1ac   : > { %p1099_p8 = por %p1098_p12, %p1097_p6 }
 0x1ae   : > { %p1100_p4 = pnand %p1099_p8, %p1093_p5 }
 0x1b0   : > { %1103 = shalt.err (!%p1100_p4)
}
 0x1b1   : > { %s1104_s21 = scalar_lea.hbm %s649_s28, 128  ;;  %s1108_s29 = scalar_lea.hbm %s1693_s3, 384 }
 0x1b2   : > { %p1105_p11 = scmp.ne.s32.totalorder %s649_s28, %s1104_s21  ;;  %p1109_p13 = scmp.lt.s32.totalorder %s649_s28, %s1693_s3 }
 0x1b3   : > { %p1110_p2 = scmp.lt.s32.totalorder %s1108_s29, %s1104_s21 }
 0x1b4   : > { %p1106_p3 = pnand %p1105_p11, %p1750_p0 }
 0x1b5   : > { %p1111_p7 = por %p1110_p2, %p1109_p13 }
 0x1b6   : > { %p1107_p10 = pneg %p1106_p3 }
 0x1b8   : > { %p1112_p9 = pnand %p1111_p7, %p1107_p10 }
 0x1ba   : > { %1115 = shalt.err (!%p1112_p9)
}
 0x1bb   : > { %920 = dma.vmem_to_hbm [thread:$0]  (%p1750_p0), %s652_s22, 128, %s649_s28, %s638_s1  }
 0x1bc PF: > { %p937_p1 = scmp.ge.s32.totalorder %s1186_s18, 2  ;;  %s663_s30 = sand.u32 1, %s1174_s15  }
 0x1bd   : > { %p1751_p5 = scmp.ne.s32.totalorder %s1705_s24, 0  ;;  %s664_s26 = scalar_lea.sflag [#allocation4], %s663_s30 }
 0x1bf   : > { %p933_p6 = pnand %p937_p1, %p1751_p5 }
 0x1c1   : > { %p934_p12 = pneg %p933_p6 }
 0x1c3   : > { %1157 = dma.done.wait (%p934_p12), %s664_s26, 128  }
 0x1c4   : > { %1159 = vsyncadd (%p934_p12), %s664_s26, 4294967168  ;;  %p19_p0 = scmp.ge.s32.totalorder %s1255_s20, 5   ;;  %s1752_s12 = smov %s1166_s13 }
 0x1c5   : > { %s1753_s13 = smov %s1170_s14  ;;  %s1754_s14 = smov %s1410_s6 }
 0x1c6   : > { %s1755_s15 = smov %s1178_s16  ;;  %s1756_s16 = smov %s1182_s17 }
 0x1c7   : > { %s1757_s17 = smov %s1266_s23  ;;  %s1758_s18 = smov %s1255_s20 }
 0x1c8   :  { %21 = sbr.rel (!%p19_p0) target bundleno = 12 (0xc), region = 109 }
 0x1cd   :  { %669 = vsyncpa [#allocation3], 1 }
 0x1ce   :  { %671 = vsyncpa [#allocation3 + $0x1], 1 }
 0x1cf   :  { %672 = vsyncpa [#allocation6], 1 }
 0x1d0   :  { %674 = vsyncpa [#allocation6 + $0x1], 1 }
 0x1d1   :  { %675 = vsyncpa [#allocation4], 1 }
 0x1d2   :  { %677 = vsyncpa [#allocation4 + $0x1], 1 }

</bundles_post_ra>
